<compile_context>
chip_gen: v7x
topology: tpu7x:2x2x1
jax: 0.10.0
libtpu: 0.0.40
codegen_flags: <defaults>
</compile_context>

<pallas_src>
import jax
import jax.numpy as jnp
from jax.experimental import pallas as pl
from jax.experimental.pallas import tpu as pltpu

_LANES = 128
_TARGET_BLOCK_BYTES = 1 << 20  # ~1 MiB per block (past the ~512-row knee)


def _drop_path_kernel(x_ref, s_ref, o_ref):
    # x_ref/o_ref: (TR, C) tile of the flattened activation.
    # s_ref:       (TR, 1) per-row scale (0.0 or 1/keep_prob), broadcast over C.
    o_ref[...] = x_ref[...] * s_ref[...]


def drop_path(x, key, drop_prob: float = 0.0, training: bool = False):
    """JAX/Pallas equivalent of the PyTorch drop_path() forward."""
    if drop_prob == 0.0 or not training:
        return x

    keep_prob = 1.0 - drop_prob
    B = x.shape[0]
    feat = 1
    for d in x.shape[1:]:
        feat *= d

    # Per-sample keep decision: floor(keep_prob + U[0,1)) -> 0 or 1, then
    # scale by 1/keep_prob.  Random draw in f32 (unbiased keep rate), scale
    # cast to x.dtype so the in-kernel multiply runs in the activation dtype.
    u = jax.random.uniform(key, (B,), dtype=jnp.float32)
    scale = (jnp.floor(keep_prob + u) / keep_prob).astype(x.dtype)  # (B,)

    itemsize = jnp.dtype(x.dtype).itemsize

    if feat % _LANES == 0:
        # Lane-dense slab: (B*rows, 128), per-row scale via repeat (tiny array,
        # ~1/128 of the activation bytes).  Tile size is independent of B/feat.
        rows_per_sample = feat // _LANES
        cols = _LANES
        x2 = x.reshape(B * rows_per_sample, _LANES)
        s2 = jnp.repeat(scale, rows_per_sample).reshape(-1, 1)
    else:
        # Ragged feature count: keep (B, feat) and give the BlockSpec the full
        # feature extent (legal when it equals the array dim) -> no pad/slice
        # round-trips.  NOTE: assumes feat*itemsize*8 fits comfortably in VMEM
        # (true for any realistic activation with a ragged feature count).
        rows_per_sample = 1
        cols = feat
        x2 = x.reshape(B, feat)
        s2 = scale.reshape(B, 1)

    total_rows = x2.shape[0]

    # Row tile: ~1 MiB per block, multiple of 8 (sublane-legal), or the full
    # row extent when the whole tensor is small (always legal).
    tr = max(1, _TARGET_BLOCK_BYTES // (cols * itemsize))
    tr = max(8, (tr // 8) * 8)
    if tr >= total_rows:
        tr = total_rows
    num_tiles = pl.cdiv(total_rows, tr)

    out2 = pl.pallas_call(
        _drop_path_kernel,
        out_shape=jax.ShapeDtypeStruct((total_rows, cols), x.dtype),
        grid=(num_tiles,),
        in_specs=[
            pl.BlockSpec((tr, cols), lambda i: (i, 0)),
            pl.BlockSpec((tr, 1), lambda i: (i, 0)),
        ],
        out_specs=pl.BlockSpec((tr, cols), lambda i: (i, 0)),
        compiler_params=pltpu.CompilerParams(
            dimension_semantics=("parallel",),
        ),
        cost_estimate=pl.CostEstimate(
            flops=total_rows * cols,
            transcendentals=0,
            bytes_accessed=2 * total_rows * cols * itemsize
            + total_rows * itemsize,
        ),
    )(x2, s2)

    return out2.reshape(x.shape)


class DropPath:
    """Drop paths (Stochastic Depth) per sample, mirroring the nn.Module."""

    def __init__(self, drop_prob=None):
        self.drop_prob = drop_prob
        self.training = True

    def __call__(self, x, key):
        return drop_path(x, key, self.drop_prob or 0.0, self.training)


if __name__ == "__main__":
    root = jax.random.PRNGKey(0)
    kx, kmask, kx2, kmask2 = jax.random.split(root, 4)

    drop_prob = 0.2
    keep_prob = 1.0 - drop_prob
    mod = DropPath(drop_prob=drop_prob)

    # --- Case 1: NCHW = (2, 4, 16, 16), feat = 1024 (lane-aligned path). ---
    x = jax.random.normal(kx, (2, 4, 16, 16), dtype=jnp.float32)
    mod.training = True
    y = jax.block_until_ready(mod(x, kmask))

    # Exact reference (same random draw as the wrapper uses).
    u = jax.random.uniform(kmask, (x.shape[0],), dtype=jnp.float32)
    scale_ref = (jnp.floor(keep_prob + u) / keep_prob).reshape(-1, 1, 1, 1)
    ref = x * scale_ref
    assert jnp.allclose(y, ref, atol=1e-6, rtol=1e-6)

    # Semantic check: each sample is either fully dropped or scaled by 1/kp.
    for b in range(x.shape[0]):
        dropped = bool(jnp.all(y[b] == 0))
        kept = bool(jnp.allclose(y[b], x[b] / keep_prob, atol=1e-6, rtol=1e-6))
        assert dropped or kept

    # --- Case 2: ragged feature count (feat = 100, not a multiple of 128). ---
    x_r = jax.random.normal(kx2, (3, 4, 5, 5), dtype=jnp.float32)
    y_r = jax.block_until_ready(mod(x_r, kmask2))
    u_r = jax.random.uniform(kmask2, (x_r.shape[0],), dtype=jnp.float32)
    scale_r = (jnp.floor(keep_prob + u_r) / keep_prob).reshape(-1, 1, 1, 1)
    assert jnp.allclose(y_r, x_r * scale_r, atol=1e-6, rtol=1e-6)

    # --- Eval / drop_prob=0 path returns input unchanged. ---
    mod.training = False
    y_eval = jax.block_until_ready(mod(x, kmask))
    assert jnp.array_equal(y_eval, x)

    print("KERNEL_OK")
</pallas_src>

<mosaic_0001>
module attributes {stable_mosaic.version = 11 : i64} {
  func.func @_drop_path_kernel(%arg0: i32, %arg1: memref<16x128xf32, #tpu.memory_space<vmem>>, %arg2: memref<16x1xf32, #tpu.memory_space<vmem>>, %arg3: memref<16x128xf32, #tpu.memory_space<vmem>>) attributes {dimension_semantics = [#tpu.dimension_semantics<parallel>], iteration_bounds = array<i64: 1>, scalar_prefetch = 0 : i64, scratch_operands = 0 : i64, tpu.core_type = #tpu.core_type<tc>, window_params = [{transform_indices = @transform_0, window_bounds = array<i64: 16, 128>}, {transform_indices = @transform_1, window_bounds = array<i64: 16, 1>}, {transform_indices = @transform_2, window_bounds = array<i64: 16, 128>}]} {
    %c0 = arith.constant 0 : index
    %c0_0 = arith.constant 0 : index
    %0 = vector.load %arg1[%c0, %c0_0] : memref<16x128xf32, #tpu.memory_space<vmem>>, vector<16x128xf32>
    %c0_1 = arith.constant 0 : index
    %c0_2 = arith.constant 0 : index
    %1 = vector.load %arg2[%c0_1, %c0_2] : memref<16x1xf32, #tpu.memory_space<vmem>>, vector<16x1xf32>
    %2 = vector.broadcast %1 : vector<16x1xf32> to vector<16x128xf32>
    %3 = arith.mulf %0, %2 : vector<16x128xf32>
    %c0_3 = arith.constant 0 : index
    %c0_4 = arith.constant 0 : index
    %4 = vector.load %arg3[%c0_3, %c0_4] : memref<16x128xf32, #tpu.memory_space<vmem>>, vector<16x128xf32>
    tpu.vector_store %arg3[%c0_3, %c0_4], %3 {strides = array<i32>} : memref<16x128xf32, #tpu.memory_space<vmem>>, vector<16x128xf32>,
    return
  }
  func.func @transform_0(%arg0: i32) -> (i32, i32) {
    %c0_i32 = arith.constant 0 : i32
    %c0_i32_0 = arith.constant 0 : i32
    return %arg0, %c0_i32 : i32, i32
  }
  func.func @transform_1(%arg0: i32) -> (i32, i32) {
    %c0_i32 = arith.constant 0 : i32
    %c0_i32_0 = arith.constant 0 : i32
    return %arg0, %c0_i32 : i32, i32
  }
  func.func @transform_2(%arg0: i32) -> (i32, i32) {
    %c0_i32 = arith.constant 0 : i32
    %c0_i32_0 = arith.constant 0 : i32
    return %arg0, %c0_i32 : i32, i32
  }
}

</mosaic_0001>

<bundles_post_ra>
// kernel: tpu_custom_call.1
= control target key start
LH: loop header
LB: loop body
LE: loop exit
PB: predicated region body
PF: predicated region fallthrough
CT: control target
= control target key end

     0   :  { %s118_s0 = inlined_call_operand.vmem [shape: f32[16,128], index: 0, kind: input, shape index: {}]   ;;  %s119_s1 = inlined_call_operand.vmem [shape: f32[16,1], index: 1, kind: input, shape index: {}]   ;;  %s120_s2 = inlined_call_operand.hbm [shape: f32[16,128], index: 2, kind: output, shape index: {}]  }
   0x1   :  { %v14_v0 = vld [vmem:[%s119_s1] sm:$0xff] }
   0x2   :  { %7 = vsyncpa [#allocation3], 0  ;;  %v75_v1 = vmov 0   ;;  %v15_v2 = vld [vmem:[%s119_s1 + $0x8] sm:$0xff]  ;;  %v12_v3 = vld [vmem:[%s118_s0] sm:$0xff]  ;;  %s76_s15 = smov [#allocation2]  }
   0x3   :  { %50 = vset.pattern.permute.xlu0 %v75_v1  ;;  %s35_s16 = sshll.u32 %s76_s15, 4  ;;  %v13_v6 = vld [vmem:[%s118_s0 + $0x8] sm:$0xff]  ;;  %s36_s16 = int_to_ptr.vmem [resolvable:$true] %s35_s16 }
   0x4   :  { %18 = vperm.xlu0 %50, %v14_v0   ;;  %s51_s19 = scalar_lea.vmem %s36_s16, 256  ;;  %p56_p1 = scmp.lt.s32.totalorder %s36_s16, %s36_s16 }
   0x5   :  { %p52_p0 = scmp.ne.s32.totalorder %s36_s16, %s51_s19  ;;  %p57_p2 = scmp.lt.s32.totalorder %s51_s19, %s51_s19 }
   0x7   :  { %p58_p3 = por %p57_p2, %p56_p1 }
   0x8   :  { %23 = vperm.xlu0 %50, %v15_v2  }
   0x9   :  { %p59_p4 = pnand %p58_p3, %p52_p0 }
  0x83   :  { %v19_v4 = vpop.permute.xlu0 %18 }
  0x84   :  { %v26_v5 = vmul.f32 %v19_v4, %v12_v3 }
  0x86   :  { %28 = vst [vmem:[#allocation2] sm:$0xff] %v26_v5 }
  0x87   :  { %v24_v7 = vpop.permute.xlu0 %23 }
  0x88   :  { %v27_v8 = vmul.f32 %v24_v7, %v13_v6 }
  0x8a   :  { %29 = vst [vmem:[#allocation2 + $0x8] sm:$0xff] %v27_v8 }
  0x8b   :  { %62 = shalt.err (!%p59_p4)
}
  0x8c   :  { %s63_s21 = scalar_lea.hbm %s120_s2, 256 }
  0x8d   :  { %p64_p5 = scmp.ne.s32.totalorder %s120_s2, %s63_s21  ;;  %p67_p6 = scmp.lt.u32.totalorder %s63_s21, %s120_s2 }
  0x8f   :  { %p69_p7 = pnand %p67_p6, %p64_p5 }
  0x91   :  { %72 = shalt.err (!%p69_p7)
}
  0x92   :  { %s77_s25 = smov 128   ;;  %s78_s26 = smov 8  }
  0x93   :  { %41 = dma.vmem_to_hbm [thread:$0]  %s36_s16, 256, %s120_s2, [#allocation3], %s77_s25, %s77_s25, %s78_s26  }
  0x94   :  { %73 = dma.done.wait [#allocation3], 256  }
  0x95   :  { %74 = vsyncadd [#allocation3], 4294967040 }
  0x96   :  { %45 = vsyncpa [#allocation3], 1 }

</bundles_post_ra>
